<compile_context>
chip_gen: v5e
topology: v5e:2x2
jax: 0.10.0
libtpu: 0.0.40
codegen_flags: <defaults>
</compile_context>

<pallas_src>
from functools import partial

import jax
import jax.numpy as jnp
from jax.experimental import pallas as pl
from jax.experimental.pallas import tpu as pltpu

_VMEM_BUDGET_BYTES = 36 * 1024 * 1024   # double-buffered kernel buffers
_VMEM_LIMIT_BYTES = 48 * 1024 * 1024    # v7x-safe scoped VMEM cap


def _round_up(x: int, m: int) -> int:
    return (x + m - 1) // m * m


def _pad_and_tile(dim: int, quantum: int, max_tile: int):
    """Return (padded_dim, tile): tile | padded_dim, tile % quantum == 0,
    padding overshoot over the minimal (quantum-aligned) pad bounded by 12.5%."""
    minimal = _round_up(dim, quantum)
    if minimal <= max_tile:
        return minimal, minimal            # single tile, tight padding
    t = max_tile
    while t > quantum:
        padded = _round_up(dim, t)
        if padded - minimal <= max(dim // 8, 0):
            return padded, t
        t //= 2
    return minimal, quantum


def _dual_linear_kernel(x_ref, w_ref, b_ref, o_ref):
    # One MXU pass per output tile: full K resident, bias added in f32,
    # result written directly in the output dtype.
    acc = jnp.dot(x_ref[0], w_ref[0], preferred_element_type=jnp.float32)
    o_ref[0] = (acc + b_ref[0]).astype(o_ref.dtype)


def _prepare_weights(key_w, key_b, value_w, value_b,
                     *, compute_dtype=jnp.bfloat16, max_tn=512):
    """One-time weight packing (hoisted out of the forward path).

    Weights are (in, out) — already transposed relative to torch's (out, in).
    Returns (w_packed (2,Kp,Np) bf16, b_packed (2,1,Np) f32, tn).
    """
    din, dout = key_w.shape
    Kp = _round_up(din, 128)
    Np, tn = _pad_and_tile(dout, 128, max_tn)
    w = jnp.stack([key_w, value_w]).astype(compute_dtype)
    w = jnp.pad(w, ((0, 0), (0, Kp - din), (0, Np - dout)))
    b = jnp.stack([key_b, value_b]).astype(jnp.float32).reshape(2, 1, dout)
    b = jnp.pad(b, ((0, 0), (0, 0), (0, Np - dout)))
    return w, b, tn


def fused_dual_linear(x_pair, w_packed, b_packed, *, tn, out_dtype):
    """out[p] = x_pair[p] @ w_packed[p] + b_packed[p], one pallas_call.

    x_pair: (2, M, Din) any float dtype; w_packed: (2, Kp, Np) compute dtype;
    b_packed: (2, 1, Np) f32.  Returns padded (2, Mp, Np) in out_dtype.
    """
    _, M, din = x_pair.shape
    _, Kp, Np = w_packed.shape
    assert din <= Kp and Np % tn == 0

    x_item = jnp.dtype(w_packed.dtype).itemsize
    o_item = jnp.dtype(out_dtype).itemsize

    # Pick tm under the VMEM budget (double-buffered x/w/b/out blocks).
    tm_max = 512
    while True:
        Mp, tm = _pad_and_tile(M, 8, tm_max)
        est = 2 * (tm * Kp * x_item + Kp * tn * x_item + tn * 4 + tm * tn * o_item)
        if est <= _VMEM_BUDGET_BYTES or tm_max <= 8:
            break
        tm_max //= 2
    # TODO(synk): for extreme Din (Kp beyond ~tens of thousands) add a K-tiled
    # accumulator fallback; adapter embedding dims never get near that.

    x = x_pair.astype(w_packed.dtype)
    if (Mp - M) or (Kp - din):
        x = jnp.pad(x, ((0, 0), (0, Mp - M), (0, Kp - din)))

    # Grid (proj, n_tile, m_tile): weight/bias block index depends only on
    # (proj, n_tile) -> stays VMEM-resident across the inner M sweep.
    grid = (2, Np // tn, Mp // tm)

    out = pl.pallas_call(
        _dual_linear_kernel,
        out_shape=jax.ShapeDtypeStruct((2, Mp, Np), out_dtype),
        grid_spec=pltpu.PrefetchScalarGridSpec(
            num_scalar_prefetch=0,
            grid=grid,
            in_specs=[
                pl.BlockSpec((1, tm, Kp), lambda p, j, i: (p, i, 0)),
                pl.BlockSpec((1, Kp, tn), lambda p, j, i: (p, 0, j)),
                pl.BlockSpec((1, 1, tn), lambda p, j, i: (p, 0, j)),
            ],
            out_specs=pl.BlockSpec((1, tm, tn), lambda p, j, i: (p, i, j)),
        ),
        compiler_params=pltpu.CompilerParams(
            # Leading proj axis (size 2) gives v7x's two TCs a balanced split.
            dimension_semantics=("parallel", "parallel", "arbitrary"),
            vmem_limit_bytes=_VMEM_LIMIT_BYTES,
        ),
    )(x, w_packed, b_packed)
    return out


@partial(jax.jit, static_argnames=("tn", "dout"))
def _adapter_forward(key_embedding, value_embedding, w_packed, b_packed,
                     *, tn, dout):
    assert key_embedding.shape == value_embedding.shape
    lead = key_embedding.shape[:-1]
    din = key_embedding.shape[-1]
    M = 1
    for d in lead:
        M *= d

    xk = key_embedding.reshape(M, din)
    xv = value_embedding.reshape(M, din)
    x_pair = jnp.stack([xk, xv])                      # (2, M, Din)

    out = fused_dual_linear(x_pair, w_packed, b_packed,
                            tn=tn, out_dtype=key_embedding.dtype)
    key_proj = out[0, :M, :dout].reshape(*lead, dout)
    value_proj = out[1, :M, :dout].reshape(*lead, dout)
    return key_proj, value_proj


class LinearAdapterPallas:
    """Pallas/JAX equivalent of the PyTorch LinearAdapter module."""

    def __init__(self, input_dim: int, output_dim: int, key: jax.Array,
                 compute_dtype=jnp.bfloat16):
        k1, k2, k3, k4 = jax.random.split(key, 4)
        bound = 1.0 / (input_dim ** 0.5)  # matches nn.Linear init range
        # Stored already transposed to (in, out) for a lane-contiguous contraction.
        self.key_w = jax.random.uniform(k1, (input_dim, output_dim),
                                        jnp.float32, -bound, bound)
        self.key_b = jax.random.uniform(k2, (output_dim,),
                                        jnp.float32, -bound, bound)
        self.value_w = jax.random.uniform(k3, (input_dim, output_dim),
                                          jnp.float32, -bound, bound)
        self.value_b = jax.random.uniform(k4, (output_dim,),
                                          jnp.float32, -bound, bound)
        self.output_dim = output_dim
        # One-time pack (stack + bf16 cast + pad) hoisted out of forward.
        self._w_packed, self._b_packed, self._tn = _prepare_weights(
            self.key_w, self.key_b, self.value_w, self.value_b,
            compute_dtype=compute_dtype)
        print(f'Initialized adapter with input dim: {input_dim}, '
              f'output dim: {output_dim}')

    def __call__(self, key_embedding: jax.Array, value_embedding: jax.Array):
        return _adapter_forward(key_embedding, value_embedding,
                                self._w_packed, self._b_packed,
                                tn=self._tn, dout=self.output_dim)

    # TODO(synk): save/load (torch.save of a state_dict) is host-side I/O with
    # no Pallas equivalent; persist the four arrays with numpy/orbax instead.


if __name__ == "__main__":
    def ref(x, w, bias):
        # Same bf16 rounding of inputs/weights, f32 accumulate, cast to x.dtype.
        xf = x.astype(jnp.bfloat16).astype(jnp.float32)
        wf = w.astype(jnp.bfloat16).astype(jnp.float32)
        y = jnp.dot(xf, wf, precision=jax.lax.Precision.HIGHEST) + bias
        return y.astype(x.dtype)

    root = jax.random.PRNGKey(0)
    k_p1, k_ke1, k_ve1, k_p2, k_ke2, k_ve2 = jax.random.split(root, 6)

    # ---- Test 1: small single-tile case (typical adapter call), f32 I/O ----
    IN1, OUT1, B1 = 32, 64, 8
    ad1 = LinearAdapterPallas(IN1, OUT1, k_p1)
    ke1 = jax.random.normal(k_ke1, (B1, IN1), jnp.float32)
    ve1 = jax.random.normal(k_ve1, (B1, IN1), jnp.float32)
    kp1, vp1 = ad1(ke1, ve1)
    jax.block_until_ready((kp1, vp1))
    assert kp1.shape == (B1, OUT1) and vp1.shape == (B1, OUT1)
    assert kp1.dtype == ke1.dtype
    rk1 = ref(ke1, ad1.key_w, ad1.key_b)
    rv1 = ref(ve1, ad1.value_w, ad1.value_b)
    assert jnp.allclose(kp1, rk1, atol=2e-3, rtol=2e-3), \
        float(jnp.max(jnp.abs(kp1 - rk1)))
    assert jnp.allclose(vp1, rv1, atol=2e-3, rtol=2e-3), \
        float(jnp.max(jnp.abs(vp1 - rv1)))

    # ---- Test 2: multi-tile M and N, ragged (non-tile-multiple) dims, bf16 I/O ----
    IN2, OUT2 = 200, 700            # Kp=256; Np=768, tn=256 -> 3 N tiles
    LEAD2 = (5, 120)                # M=600 -> Mp=640, tm=128 -> 5 M tiles
    ad2 = LinearAdapterPallas(IN2, OUT2, k_p2)
    ke2 = jax.random.normal(k_ke2, LEAD2 + (IN2,), jnp.bfloat16)
    ve2 = jax.random.normal(k_ve2, LEAD2 + (IN2,), jnp.bfloat16)
    kp2, vp2 = ad2(ke2, ve2)
    jax.block_until_ready((kp2, vp2))
    assert kp2.shape == LEAD2 + (OUT2,) and vp2.shape == LEAD2 + (OUT2,)
    assert kp2.dtype == jnp.bfloat16    # kernel writes bf16 directly
    rk2 = ref(ke2.reshape(-1, IN2), ad2.key_w, ad2.key_b).reshape(LEAD2 + (OUT2,))
    rv2 = ref(ve2.reshape(-1, IN2), ad2.value_w, ad2.value_b).reshape(LEAD2 + (OUT2,))
    assert jnp.allclose(kp2.astype(jnp.float32), rk2.astype(jnp.float32),
                        atol=2e-2, rtol=2e-2), \
        float(jnp.max(jnp.abs(kp2.astype(jnp.float32) - rk2.astype(jnp.float32))))
    assert jnp.allclose(vp2.astype(jnp.float32), rv2.astype(jnp.float32),
                        atol=2e-2, rtol=2e-2), \
        float(jnp.max(jnp.abs(vp2.astype(jnp.float32) - rv2.astype(jnp.float32))))

    print("KERNEL_OK")
</pallas_src>

<mosaic_0001>
module attributes {stable_mosaic.version = 11 : i64} {
  func.func @_dual_linear_kernel(%arg0: i32, %arg1: i32, %arg2: i32, %arg3: memref<1x8x128xbf16, #tpu.memory_space<vmem>>, %arg4: memref<1x128x128xbf16, #tpu.memory_space<vmem>>, %arg5: memref<1x1x128xf32, #tpu.memory_space<vmem>>, %arg6: memref<1x8x128xf32, #tpu.memory_space<vmem>>) attributes {dimension_semantics = [#tpu.dimension_semantics<parallel>, #tpu.dimension_semantics<parallel>, #tpu.dimension_semantics<arbitrary>], iteration_bounds = array<i64: 2, 1, 1>, scalar_prefetch = 0 : i64, scratch_operands = 0 : i64, tpu.core_type = #tpu.core_type<tc>, window_params = [{transform_indices = @transform_0, window_bounds = array<i64: 1, 8, 128>}, {transform_indices = @transform_1, window_bounds = array<i64: 1, 128, 128>}, {transform_indices = @transform_2, window_bounds = array<i64: 1, 1, 128>}, {transform_indices = @transform_3, window_bounds = array<i64: 1, 8, 128>}]} {
    %c0 = arith.constant 0 : index
    %c0_0 = arith.constant 0 : index
    %c0_1 = arith.constant 0 : index
    %0 = vector.load %arg3[%c0, %c0_0, %c0_1] : memref<1x8x128xbf16, #tpu.memory_space<vmem>>, vector<1x8x128xbf16>
    %1 = vector.shape_cast %0 : vector<1x8x128xbf16> to vector<8x128xbf16>
    %c0_2 = arith.constant 0 : index
    %c0_3 = arith.constant 0 : index
    %c0_4 = arith.constant 0 : index
    %2 = vector.load %arg4[%c0_2, %c0_3, %c0_4] : memref<1x128x128xbf16, #tpu.memory_space<vmem>>, vector<1x128x128xbf16>
    %3 = vector.shape_cast %2 : vector<1x128x128xbf16> to vector<128x128xbf16>
    %cst = arith.constant dense<0.000000e+00> : vector<8x128xf32>
    %4 = tpu.matmul %1, %3, %cst {dimension_numbers = #tpu.dot_dimension_numbers<[1], [0], [0], [1], [0, 0, 1, 1], [], []>} : vector<8x128xbf16>, vector<128x128xbf16>, vector<8x128xf32> -> vector<8x128xf32>
    %c0_5 = arith.constant 0 : index
    %c0_6 = arith.constant 0 : index
    %c0_7 = arith.constant 0 : index
    %5 = vector.load %arg5[%c0_5, %c0_6, %c0_7] : memref<1x1x128xf32, #tpu.memory_space<vmem>>, vector<1x1x128xf32>
    %6 = vector.shape_cast %5 : vector<1x1x128xf32> to vector<1x128xf32>
    %7 = vector.broadcast %6 : vector<1x128xf32> to vector<8x128xf32>
    %8 = arith.addf %4, %7 : vector<8x128xf32>
    %c0_8 = arith.constant 0 : index
    %c0_9 = arith.constant 0 : index
    %c0_10 = arith.constant 0 : index
    %9 = vector.load %arg6[%c0_8, %c0_9, %c0_10] : memref<1x8x128xf32, #tpu.memory_space<vmem>>, vector<1x8x128xf32>
    %10 = vector.shape_cast %9 : vector<1x8x128xf32> to vector<8x128xf32>
    %11 = vector.shape_cast %8 : vector<8x128xf32> to vector<1x8x128xf32>
    tpu.vector_store %arg6[%c0_8, %c0_9, %c0_10], %11 {strides = array<i32>} : memref<1x8x128xf32, #tpu.memory_space<vmem>>, vector<1x8x128xf32>,
    return
  }
  func.func @transform_0(%arg0: i32, %arg1: i32, %arg2: i32) -> (i32, i32, i32) {
    %c0_i32 = arith.constant 0 : i32
    %c0_i32_0 = arith.constant 0 : i32
    return %arg0, %arg2, %c0_i32 : i32, i32, i32
  }
  func.func @transform_1(%arg0: i32, %arg1: i32, %arg2: i32) -> (i32, i32, i32) {
    %c0_i32 = arith.constant 0 : i32
    %c0_i32_0 = arith.constant 0 : i32
    return %arg0, %c0_i32, %arg1 : i32, i32, i32
  }
  func.func @transform_2(%arg0: i32, %arg1: i32, %arg2: i32) -> (i32, i32, i32) {
    %c0_i32 = arith.constant 0 : i32
    %c0_i32_0 = arith.constant 0 : i32
    return %arg0, %c0_i32, %arg1 : i32, i32, i32
  }
  func.func @transform_3(%arg0: i32, %arg1: i32, %arg2: i32) -> (i32, i32, i32) {
    %c0_i32 = arith.constant 0 : i32
    return %arg0, %arg2, %arg1 : i32, i32, i32
  }
}

</mosaic_0001>

<bundles_post_ra>
// kernel: _adapter_forward.1
= control target key start
LH: loop header
LB: loop body
LE: loop exit
PB: predicated region body
PF: predicated region fallthrough
CT: control target
= control target key end

     0   :  { %8 = vsyncpa [#allocation3], 0  ;;  %s800_s0 = inlined_call_operand.vmem [shape: bf16[2,8,128], index: 0, kind: input, shape index: {}]   ;;  %s801_s1 = inlined_call_operand.hbm [shape: bf16[2,128,128], index: 1, kind: input, shape index: {}]   ;;  %s802_s2 = inlined_call_operand.vmem [shape: f32[2,1,128], index: 2, kind: input, shape index: {}]   ;;  %s803_s3 = inlined_call_operand.vmem [shape: f32[2,8,128], index: 3, kind: output, shape index: {}]  }
   0x1   :  { %10 = vsyncpa [#allocation3 + $0x1], 0  ;;  %s706_s12 = smov 0   ;;  %s708_s13 = smov 0  }
   0x2   :  { %s710_s14 = smov 0   ;;  %s712_s15 = smov 0  }
   0x3   :  { %s714_s16 = smov 0   ;;  %s716_s17 = smov 0  }
   0x4 LB: > { %s490_s18 = sadd.s32 4294967295, %s682_s17   ;;  %s35_s19 = sadd.s32 1, %s678_s16  ;;  %s682_s17 = sphi %s716_s17, %s16_s17   ;;  %s678_s16 = sphi %s714_s16, %s810_s16   ;;  %s674_s15 = sphi %s712_s15, %s809_s15   ;;  %s670_s14 = sphi %s710_s14, %s808_s14   ;;  %s666_s13 = sphi %s708_s13, %s807_s13   ;;  %s662_s12 = sphi %s706_s12, %s806_s12  }
   0x5   : > { %p37_p0 = scmp.ge.s32.totalorder %s35_s19, 2  ;;  %s72_s20 = sadd.s32 1, %s670_s14 }
   0x6   : > { %p79_p1 = scmp.ne.s32.totalorder %s670_s14, %s666_s13  ;;  %p80_p2 = scmp.eq.s32.totalorder %s682_s17, 0 }
   0x7   : > { %s812_s19 = smov (%p37_p0, %s35_s19), 0  ;;  %p85_p4 = scmp.ne.s32.totalorder %s666_s13, %s662_s12 }
   0x8   : > { %p742_p3 = por %p80_p2, %p79_p1  ;;  %s67_s22 = ssub.s32 %s678_s16, %s812_s19 }
   0x9   : > { %p86_p5 = scmp.eq.s32.totalorder %s490_s18, 0  ;;  %p70_p6 = scmp.eq.s32.totalorder %s67_s22, 0 }
   0xa   : > { %p550_p8 = scmp.lt.s32.totalorder %s682_s17, 2  ;;  %s177_s25 = sand.u32 1, %s670_s14  }
   0xb   : > { %p749_p7 = por %p86_p5, %p85_p4  ;;  %s535_s26 = sshll.u32 %s678_s16, 6 }
   0xc   : > { %s755_s24 = scalar_select %p70_p6, %s670_s14, %s72_s20  }
   0xd   : > { %s494_s27 = sshll.u32 %s177_s25, 6  ;;  %s187_s30 = scalar_lea.hbm %s801_s1, %s535_s26 }
   0xe   : > { %s188_s4 = sshll.u32 %s187_s30, 4  ;;  %s181_s5 = scalar_lea.vmem [#allocation2], %s494_s27  ;;  %s189_s4 = int_to_ptr.hbm [resolvable:$true] %s188_s4 }
   0xf   : > { %s190_s6 = sshll.u32 %s181_s5, 4  ;;  %p547_p9 = pnand %p550_p8, %p742_p3  ;;  %s191_s6 = int_to_ptr.vmem [resolvable:$true] %s190_s6 }
  0x10   : > { %p497_p10 = scmp.ge.s32.totalorder %s682_s17, 1  ;;  %p207_p11 = scmp.lt.s32.totalorder %s682_s17, 3 }
  0x11   : > { %s178_s7 = scalar_lea.sflag [#allocation3], %s177_s25  ;;  %s684_s8 = smov 64  }
  0x12   : > { %s685_s9 = smov 4   ;;  %p208_p12 = pnand %p497_p10, %p207_p11 }
  0x13   : > { %549 = dma.hbm_to_vmem [thread:$0]  (!%p547_p9), %s189_s4, 1024, %s191_s6, %s178_s7, %s684_s8, %s684_s8, %s685_s9  }
  0x14   : > { %211 = sbr.rel (%p208_p12) target bundleno = 192 (0xc0), region = 32  ;;  %s213_s10 = sand.u32 (!%p208_p12), 1, %s666_s13  }
  0x15   : > { %s498_s11 = sshll.u32 (!%p208_p12), %s213_s10, 6  ;;  %s214_s12 = scalar_lea.sflag (!%p208_p12), [#allocation3], %s213_s10 }
  0x16   : > { %s217_s18 = scalar_lea.vmem (!%p208_p12), [#allocation2], %s498_s11 }
  0x19   : > { %657 = dma.done.wait (%p749_p7), %s214_s12, 1024  }
  0x1a   : > { %659 = vsyncadd (%p749_p7), %s214_s12, 4294966272  ;;  %p259_p13 = scmp.lt.s32.totalorder %s674_s15, 1  ;;  %v543_v0 = vld [vmem:[%s217_s18 + $0x38] sm:$0xff]  ;;  %v542_v1 = vld [vmem:[%s217_s18 + $0x30] sm:$0xff] }
  0x1b   : > { %351 = vmatpush.bf16.msra.mxu0 %v543_v0  ;;  %v541_v2 = vld [vmem:[%s217_s18 + $0x28] sm:$0xff]  ;;  %v540_v3 = vld [vmem:[%s217_s18 + $0x20] sm:$0xff]  ;;  %v539_v4 = vld [vmem:[%s217_s18 + $0x18] sm:$0xff] }
  0x1c   : > { %s814_s15 = smov (!%p259_p13, %s674_s15), 1  ;;  %v538_v5 = vld [vmem:[%s217_s18 + $0x10] sm:$0xff]  ;;  %v537_v6 = vld [vmem:[%s217_s18 + $0x8] sm:$0xff]  ;;  %v536_v7 = vld [vmem:[%s217_s18] sm:$0xff] }
  0x1d   : > { %s271_s22 = scalar_lea.vmem %s802_s2, %s814_s15  ;;  %s499_s23 = sshll.u32 %s814_s15, 2 }
  0x1e   : > { %s265_s27 = scalar_lea.vmem %s800_s0, %s499_s23  ;;  %s500_s28 = sshll.u32 %s814_s15, 3  ;;  %v601_v9 = vld [vmem:[%s271_s22] ss:$0 sm:$0xff] }
  0x1f   : > { %352 = vmatpush.bf16.msra.mxu0 %v542_v1  ;;  %v282_v8 = vld [vmem:[%s265_s27] sm:$0xf]  ;;  %s281_s4 = scalar_lea.vmem %s803_s3, %s500_s28 }
  0x23   : > { %353 = vmatpush.bf16.msra.mxu0 %v541_v2 }
  0x27   : > { %354 = vmatpush.bf16.msra.mxu0 %v540_v3 }
  0x2b   : > { %355 = vmatpush.bf16.msra.mxu0 %v539_v4 }
  0x2f   : > { %356 = vmatpush.bf16.msra.mxu0 %v538_v5 }
  0x33   : > { %357 = vmatpush.bf16.msra.mxu0 %v537_v6 }
  0x37   : > { %358 = vmatpush.bf16.msra.mxu0 %v536_v7 }
  0x3a   : > { %359 = vmatmul.bf16.vlgmr.msra.gmra.mxu0 %v282_v8 }
  0xb7   : > { %v360_v10 = vpop.f32.mrf.mxu0 }
  0xb8   : > { %v361_v11 = vadd.f32 %v601_v9, %v360_v10 }
  0xba   : > { %364 = vst [vmem:[%s281_s4] sm:$0xff] %v361_v11 }
  0xbf   : > { %v362_v12 = vpop.f32.mrf.mxu0 }
  0xc0 PF: > { %s16_s17 = sadd.s32 1, %s682_s17   ;;  %s806_s12 = smov %s666_s13 }
  0xc1   : > { %p13_p0 = scmp.ge.s32.totalorder %s16_s17, 4   ;;  %s807_s13 = smov %s670_s14 }
  0xc2   : > { %s808_s14 = smov %s755_s24  ;;  %s809_s15 = smov %s678_s16 }
  0xc3   : > { %s810_s16 = smov %s812_s19  ;;  %15 = sbr.rel (!%p13_p0) target bundleno = 4 (0x4), region = 78 }
  0xc8   :  { %396 = vsyncpa [#allocation3], 1 }
  0xc9   :  { %398 = vsyncpa [#allocation3 + $0x1], 1 }

</bundles_post_ra>
